<compile_context>
chip_gen: v7x
topology: tpu7x:2x2x1
jax: 0.10.0
libtpu: 0.0.40
codegen_flags: <defaults>
</compile_context>

<pallas_src>
import jax
import jax.numpy as jnp
from jax.experimental import pallas as pl
from jax.experimental.pallas import tpu as pltpu

HIDDEN_SIZE = 76
INPUT_SIZE = 784
NUM_CLASSES = 10

LANE = 128        # padded feature width for every hidden/output layer
SUBLANE = 8
DEFAULT_TB = 2048  # batch tile; multiple of 8 (use tb=4096 on v7x if desired)


def _round_up(x, m):
    return (x + m - 1) // m * m


def mlp_kernel(x_ref,
               w1_ref, b1_ref,
               w2_ref, b2_ref,
               w3_ref, b3_ref,
               w4_ref, b4_ref,
               o_ref):
    """One batch tile of the fused forward pass. bf16 operands, f32 MXU accumulate."""
    # In-kernel cast: x arrives at native dtype, avoiding a separate XLA astype pass.
    x = x_ref[...].astype(jnp.bfloat16)                                        # (TB, 784)

    h = jnp.dot(x, w1_ref[...], preferred_element_type=jnp.float32) + b1_ref[...]
    h = jnp.maximum(h, 0.0).astype(jnp.bfloat16)                               # (TB, 128)

    h = jnp.dot(h, w2_ref[...], preferred_element_type=jnp.float32) + b2_ref[...]
    h = jnp.maximum(h, 0.0).astype(jnp.bfloat16)

    h = jnp.dot(h, w3_ref[...], preferred_element_type=jnp.float32) + b3_ref[...]
    h = jnp.maximum(h, 0.0).astype(jnp.bfloat16)

    # fc4 (no activation); f32 result -> lane-dense (TB, 128) store.
    o_ref[...] = jnp.dot(h, w4_ref[...], preferred_element_type=jnp.float32) + b4_ref[...]


def _vmem_limit_bytes(tb, x_itemsize):
    """Budget: double-buffered x/out tiles + resident weights + TB-scaled intermediates."""
    x_tile = tb * INPUT_SIZE * x_itemsize
    out_tile = tb * LANE * 4                                  # f32 output tile
    w_bytes = (INPUT_SIZE * LANE + 3 * LANE * LANE) * 2       # bf16 weights
    b_bytes = 4 * LANE * 4                                    # f32 biases
    interm = 4 * tb * LANE * (4 + 2)                          # live f32 acc + bf16 act per layer
    limit = 2 * (x_tile + out_tile) + 2 * (w_bytes + b_bytes) + interm + (4 << 20)
    return int(min(limit, 64 << 20))                          # stay legal on v7x (64 MiB VMEM)


def _choose_tb(batch, target_tb):
    """Pick a batch tile: multiple of 8, and small enough that the grid has >= 2
    steps when the batch allows it (so v7x's 2 TensorCores both get work)."""
    half = _round_up(pl.cdiv(batch, 2), SUBLANE)
    tb = min(_round_up(max(target_tb, SUBLANE), SUBLANE), half)
    return max(tb, SUBLANE)


def neural_net_forward(x, prepared, *, tb=DEFAULT_TB):
    """Forward pass via the fused Pallas kernel.

    x:        (B, 784) float32 (or bf16) -- passed through at native dtype
    prepared: dict of padded bf16 weights w1..w4 and f32 biases b1..b4 (1, 128)
    returns:  (B, 10) float32 logits
    """
    B = x.shape[0]
    TB = _choose_tb(B, tb)
    grid = (pl.cdiv(B, TB),)   # ragged last block handled by Pallas; no jnp.pad copy

    w1, b1 = prepared["w1"], prepared["b1"]
    w2, b2 = prepared["w2"], prepared["b2"]
    w3, b3 = prepared["w3"], prepared["b3"]
    w4, b4 = prepared["w4"], prepared["b4"]

    # Weights/biases: constant index_map -> DMA'd once, VMEM-resident across steps.
    const_spec = lambda shape: pl.BlockSpec(shape, lambda i: (0, 0))

    out_padded = pl.pallas_call(
        mlp_kernel,
        out_shape=jax.ShapeDtypeStruct((B, LANE), jnp.float32),
        grid=grid,
        in_specs=[
            pl.BlockSpec((TB, INPUT_SIZE), lambda i: (i, 0)),   # x tile, pipelined over batch
            const_spec(w1.shape), const_spec(b1.shape),
            const_spec(w2.shape), const_spec(b2.shape),
            const_spec(w3.shape), const_spec(b3.shape),
            const_spec(w4.shape), const_spec(b4.shape),
        ],
        out_specs=pl.BlockSpec((TB, LANE), lambda i: (i, 0)),
        compiler_params=pltpu.CompilerParams(
            dimension_semantics=("parallel",),
            vmem_limit_bytes=_vmem_limit_bytes(TB, jnp.dtype(x.dtype).itemsize),
        ),
    )(x, w1, b1, w2, b2, w3, b3, w4, b4)

    return out_padded[:B, :NUM_CLASSES]


def init_params(key):
    """Logical params matching the PyTorch module (stored as (in, out) + (out,)).

    nn.Linear(in, out) has weight (out, in); we store its transpose (in, out).
    Uses uniform(-1/sqrt(in), 1/sqrt(in)) like PyTorch's default init.
    """
    dims = [
        (INPUT_SIZE, HIDDEN_SIZE),              # fc1: 784 -> 76
        (HIDDEN_SIZE, HIDDEN_SIZE // 2),        # fc2: 76  -> 38
        (HIDDEN_SIZE // 2, HIDDEN_SIZE // 4),   # fc3: 38  -> 19
        (HIDDEN_SIZE // 4, NUM_CLASSES),        # fc4: 19  -> 10
    ]
    params = {}
    keys = jax.random.split(key, 2 * len(dims))
    for i, (fan_in, fan_out) in enumerate(dims):
        bound = 1.0 / (fan_in ** 0.5)
        params[f"w{i + 1}"] = jax.random.uniform(
            keys[2 * i], (fan_in, fan_out), minval=-bound, maxval=bound, dtype=jnp.float32)
        params[f"b{i + 1}"] = jax.random.uniform(
            keys[2 * i + 1], (fan_out,), minval=-bound, maxval=bound, dtype=jnp.float32)
    return params


def prepare_params(params):
    """Zero-pad feature dims to 128 lanes once at init; cast weights to bf16, keep biases f32."""
    prepared = {}
    for i in range(1, 5):
        w = params[f"w{i}"]
        b = params[f"b{i}"]
        fan_in, fan_out = w.shape
        in_pad = INPUT_SIZE if i == 1 else LANE     # previous layer's padded width
        out_pad = LANE
        w_p = jnp.zeros((in_pad, out_pad), jnp.float32).at[:fan_in, :fan_out].set(w)
        b_p = jnp.zeros((1, out_pad), jnp.float32).at[0, :fan_out].set(b)
        prepared[f"w{i}"] = w_p.astype(jnp.bfloat16)
        prepared[f"b{i}"] = b_p                      # bias stays f32 (added post-accumulate)
    return prepared


def reference_forward(x, prepared):
    """Pure-JAX reference on the same bf16/padded operands (f32 accumulation)."""
    h = x.astype(jnp.bfloat16)
    for i in range(1, 4):
        h = jnp.dot(h, prepared[f"w{i}"], preferred_element_type=jnp.float32) + prepared[f"b{i}"]
        h = jnp.maximum(h, 0.0).astype(jnp.bfloat16)
    out = jnp.dot(h, prepared["w4"], preferred_element_type=jnp.float32) + prepared["b4"]
    return out[:, :NUM_CLASSES]


if __name__ == "__main__":
    key = jax.random.PRNGKey(0)
    k_x1, k_x2, k_p = jax.random.split(key, 3)
    params = init_params(k_p)
    prepared = prepare_params(params)

    # Case 1: tiny batch -> single grid step, TB clamps down to 8.
    x_small = jax.random.normal(k_x1, (8, INPUT_SIZE), dtype=jnp.float32)
    out_small = jax.block_until_ready(neural_net_forward(x_small, prepared))
    ref_small = reference_forward(x_small, prepared)
    assert out_small.shape == (8, NUM_CLASSES)
    assert jnp.allclose(out_small, ref_small, atol=1e-3, rtol=1e-3), "mismatch (small batch)"

    # Case 2: batch not a multiple of the tile -> 2-step grid with a ragged
    # (Pallas-masked) boundary block and no jnp.pad copy.
    x_big = jax.random.normal(k_x2, (200, INPUT_SIZE), dtype=jnp.float32)
    out_big = jax.block_until_ready(neural_net_forward(x_big, prepared))
    ref_big = reference_forward(x_big, prepared)
    assert out_big.shape == (200, NUM_CLASSES)
    assert jnp.allclose(out_big, ref_big, atol=1e-3, rtol=1e-3), "mismatch (tiled batch)"

    print("KERNEL_OK")
</pallas_src>

<mosaic_0001>
module attributes {stable_mosaic.version = 11 : i64} {
  func.func @mlp_kernel(%arg0: i32, %arg1: memref<8x784xf32, #tpu.memory_space<vmem>>, %arg2: memref<784x128xbf16, #tpu.memory_space<vmem>>, %arg3: memref<1x128xf32, #tpu.memory_space<vmem>>, %arg4: memref<128x128xbf16, #tpu.memory_space<vmem>>, %arg5: memref<1x128xf32, #tpu.memory_space<vmem>>, %arg6: memref<128x128xbf16, #tpu.memory_space<vmem>>, %arg7: memref<1x128xf32, #tpu.memory_space<vmem>>, %arg8: memref<128x128xbf16, #tpu.memory_space<vmem>>, %arg9: memref<1x128xf32, #tpu.memory_space<vmem>>, %arg10: memref<8x128xf32, #tpu.memory_space<vmem>>) attributes {dimension_semantics = [#tpu.dimension_semantics<parallel>], iteration_bounds = array<i64: 1>, scalar_prefetch = 0 : i64, scratch_operands = 0 : i64, tpu.core_type = #tpu.core_type<tc>, window_params = [{transform_indices = @transform_0, window_bounds = array<i64: 8, 784>}, {pipeline_mode = #tpu.pipeline_mode<synchronous>, transform_indices = @transform_1, window_bounds = array<i64: 784, 128>}, {pipeline_mode = #tpu.pipeline_mode<synchronous>, transform_indices = @transform_2, window_bounds = array<i64: 1, 128>}, {pipeline_mode = #tpu.pipeline_mode<synchronous>, transform_indices = @transform_3, window_bounds = array<i64: 128, 128>}, {pipeline_mode = #tpu.pipeline_mode<synchronous>, transform_indices = @transform_4, window_bounds = array<i64: 1, 128>}, {pipeline_mode = #tpu.pipeline_mode<synchronous>, transform_indices = @transform_5, window_bounds = array<i64: 128, 128>}, {pipeline_mode = #tpu.pipeline_mode<synchronous>, transform_indices = @transform_6, window_bounds = array<i64: 1, 128>}, {pipeline_mode = #tpu.pipeline_mode<synchronous>, transform_indices = @transform_7, window_bounds = array<i64: 128, 128>}, {pipeline_mode = #tpu.pipeline_mode<synchronous>, transform_indices = @transform_8, window_bounds = array<i64: 1, 128>}, {transform_indices = @transform_9, window_bounds = array<i64: 8, 128>}]} {
    %c0 = arith.constant 0 : index
    %c0_0 = arith.constant 0 : index
    %0 = vector.load %arg1[%c0, %c0_0] : memref<8x784xf32, #tpu.memory_space<vmem>>, vector<8x784xf32>
    %1 = arith.truncf %0 : vector<8x784xf32> to vector<8x784xbf16>
    %c0_1 = arith.constant 0 : index
    %c0_2 = arith.constant 0 : index
    %2 = vector.load %arg2[%c0_1, %c0_2] : memref<784x128xbf16, #tpu.memory_space<vmem>>, vector<784x128xbf16>
    %cst = arith.constant dense<0.000000e+00> : vector<8x128xf32>
    %3 = tpu.matmul %1, %2, %cst {dimension_numbers = #tpu.dot_dimension_numbers<[1], [0], [0], [1], [0, 0, 1, 1], [], []>} : vector<8x784xbf16>, vector<784x128xbf16>, vector<8x128xf32> -> vector<8x128xf32>
    %c0_3 = arith.constant 0 : index
    %c0_4 = arith.constant 0 : index
    %4 = vector.load %arg3[%c0_3, %c0_4] : memref<1x128xf32, #tpu.memory_space<vmem>>, vector<1x128xf32>
    %5 = vector.broadcast %4 : vector<1x128xf32> to vector<8x128xf32>
    %6 = arith.addf %3, %5 : vector<8x128xf32>
    %cst_5 = arith.constant 0.000000e+00 : f32
    %7 = vector.broadcast %cst_5 : f32 to vector<8x128xf32>
    %8 = arith.maximumf %6, %7 : vector<8x128xf32>
    %9 = arith.truncf %8 : vector<8x128xf32> to vector<8x128xbf16>
    %c0_6 = arith.constant 0 : index
    %c0_7 = arith.constant 0 : index
    %10 = vector.load %arg4[%c0_6, %c0_7] : memref<128x128xbf16, #tpu.memory_space<vmem>>, vector<128x128xbf16>
    %cst_8 = arith.constant dense<0.000000e+00> : vector<8x128xf32>
    %11 = tpu.matmul %9, %10, %cst_8 {dimension_numbers = #tpu.dot_dimension_numbers<[1], [0], [0], [1], [0, 0, 1, 1], [], []>} : vector<8x128xbf16>, vector<128x128xbf16>, vector<8x128xf32> -> vector<8x128xf32>
    %c0_9 = arith.constant 0 : index
    %c0_10 = arith.constant 0 : index
    %12 = vector.load %arg5[%c0_9, %c0_10] : memref<1x128xf32, #tpu.memory_space<vmem>>, vector<1x128xf32>
    %13 = vector.broadcast %12 : vector<1x128xf32> to vector<8x128xf32>
    %14 = arith.addf %11, %13 : vector<8x128xf32>
    %cst_11 = arith.constant 0.000000e+00 : f32
    %15 = vector.broadcast %cst_11 : f32 to vector<8x128xf32>
    %16 = arith.maximumf %14, %15 : vector<8x128xf32>
    %17 = arith.truncf %16 : vector<8x128xf32> to vector<8x128xbf16>
    %c0_12 = arith.constant 0 : index
    %c0_13 = arith.constant 0 : index
    %18 = vector.load %arg6[%c0_12, %c0_13] : memref<128x128xbf16, #tpu.memory_space<vmem>>, vector<128x128xbf16>
    %cst_14 = arith.constant dense<0.000000e+00> : vector<8x128xf32>
    %19 = tpu.matmul %17, %18, %cst_14 {dimension_numbers = #tpu.dot_dimension_numbers<[1], [0], [0], [1], [0, 0, 1, 1], [], []>} : vector<8x128xbf16>, vector<128x128xbf16>, vector<8x128xf32> -> vector<8x128xf32>
    %c0_15 = arith.constant 0 : index
    %c0_16 = arith.constant 0 : index
    %20 = vector.load %arg7[%c0_15, %c0_16] : memref<1x128xf32, #tpu.memory_space<vmem>>, vector<1x128xf32>
    %21 = vector.broadcast %20 : vector<1x128xf32> to vector<8x128xf32>
    %22 = arith.addf %19, %21 : vector<8x128xf32>
    %cst_17 = arith.constant 0.000000e+00 : f32
    %23 = vector.broadcast %cst_17 : f32 to vector<8x128xf32>
    %24 = arith.maximumf %22, %23 : vector<8x128xf32>
    %25 = arith.truncf %24 : vector<8x128xf32> to vector<8x128xbf16>
    %c0_18 = arith.constant 0 : index
    %c0_19 = arith.constant 0 : index
    %26 = vector.load %arg8[%c0_18, %c0_19] : memref<128x128xbf16, #tpu.memory_space<vmem>>, vector<128x128xbf16>
    %cst_20 = arith.constant dense<0.000000e+00> : vector<8x128xf32>
    %27 = tpu.matmul %25, %26, %cst_20 {dimension_numbers = #tpu.dot_dimension_numbers<[1], [0], [0], [1], [0, 0, 1, 1], [], []>} : vector<8x128xbf16>, vector<128x128xbf16>, vector<8x128xf32> -> vector<8x128xf32>
    %c0_21 = arith.constant 0 : index
    %c0_22 = arith.constant 0 : index
    %28 = vector.load %arg9[%c0_21, %c0_22] : memref<1x128xf32, #tpu.memory_space<vmem>>, vector<1x128xf32>
    %29 = vector.broadcast %28 : vector<1x128xf32> to vector<8x128xf32>
    %30 = arith.addf %27, %29 : vector<8x128xf32>
    %c0_23 = arith.constant 0 : index
    %c0_24 = arith.constant 0 : index
    %31 = vector.load %arg10[%c0_23, %c0_24] : memref<8x128xf32, #tpu.memory_space<vmem>>, vector<8x128xf32>
    tpu.vector_store %arg10[%c0_23, %c0_24], %30 {strides = array<i32>} : memref<8x128xf32, #tpu.memory_space<vmem>>, vector<8x128xf32>,
    return
  }
  func.func @transform_0(%arg0: i32) -> (i32, i32) {
    %c0_i32 = arith.constant 0 : i32
    %c0_i32_0 = arith.constant 0 : i32
    return %arg0, %c0_i32 : i32, i32
  }
  func.func @transform_1(%arg0: i32) -> (i32, i32) {
    %c0_i32 = arith.constant 0 : i32
    %c0_i32_0 = arith.constant 0 : i32
    %c0_i32_1 = arith.constant 0 : i32
    return %c0_i32, %c0_i32_0 : i32, i32
  }
  func.func @transform_2(%arg0: i32) -> (i32, i32) {
    %c0_i32 = arith.constant 0 : i32
    %c0_i32_0 = arith.constant 0 : i32
    %c0_i32_1 = arith.constant 0 : i32
    return %c0_i32, %c0_i32_0 : i32, i32
  }
  func.func @transform_3(%arg0: i32) -> (i32, i32) {
    %c0_i32 = arith.constant 0 : i32
    %c0_i32_0 = arith.constant 0 : i32
    %c0_i32_1 = arith.constant 0 : i32
    return %c0_i32, %c0_i32_0 : i32, i32
  }
  func.func @transform_4(%arg0: i32) -> (i32, i32) {
    %c0_i32 = arith.constant 0 : i32
    %c0_i32_0 = arith.constant 0 : i32
    %c0_i32_1 = arith.constant 0 : i32
    return %c0_i32, %c0_i32_0 : i32, i32
  }
  func.func @transform_5(%arg0: i32) -> (i32, i32) {
    %c0_i32 = arith.constant 0 : i32
    %c0_i32_0 = arith.constant 0 : i32
    %c0_i32_1 = arith.constant 0 : i32
    return %c0_i32, %c0_i32_0 : i32, i32
  }
  func.func @transform_6(%arg0: i32) -> (i32, i32) {
    %c0_i32 = arith.constant 0 : i32
    %c0_i32_0 = arith.constant 0 : i32
    %c0_i32_1 = arith.constant 0 : i32
    return %c0_i32, %c0_i32_0 : i32, i32
  }
  func.func @transform_7(%arg0: i32) -> (i32, i32) {
    %c0_i32 = arith.constant 0 : i32
    %c0_i32_0 = arith.constant 0 : i32
    %c0_i32_1 = arith.constant 0 : i32
    return %c0_i32, %c0_i32_0 : i32, i32
  }
  func.func @transform_8(%arg0: i32) -> (i32, i32) {
    %c0_i32 = arith.constant 0 : i32
    %c0_i32_0 = arith.constant 0 : i32
    %c0_i32_1 = arith.constant 0 : i32
    return %c0_i32, %c0_i32_0 : i32, i32
  }
  func.func @transform_9(%arg0: i32) -> (i32, i32) {
    %c0_i32 = arith.constant 0 : i32
    %c0_i32_0 = arith.constant 0 : i32
    return %arg0, %c0_i32 : i32, i32
  }
}

</mosaic_0001>

<bundles_post_ra>
// kernel: tpu_custom_call.1
= control target key start
LH: loop header
LB: loop body
LE: loop exit
PB: predicated region body
PF: predicated region fallthrough
CT: control target
= control target key end

     0   :  { %14 = vsyncpa [#allocation3], 0  ;;  %s1685_s0 = inlined_call_operand.hbm [shape: f32[8,784], index: 0, kind: input, shape index: {}]   ;;  %s1686_s1 = inlined_call_operand.hbm [shape: bf16[784,128], index: 1, kind: input, shape index: {}]   ;;  %s1687_s2 = inlined_call_operand.vmem [shape: f32[1,128], index: 2, kind: input, shape index: {}]   ;;  %s1688_s3 = inlined_call_operand.hbm [shape: bf16[128,128], index: 3, kind: input, shape index: {}]   ;;  %s1689_s4 = inlined_call_operand.vmem [shape: f32[1,128], index: 4, kind: input, shape index: {}]   ;;  %s1690_s5 = inlined_call_operand.hbm [shape: bf16[128,128], index: 5, kind: input, shape index: {}]   ;;  %s1691_s6 = inlined_call_operand.vmem [shape: f32[1,128], index: 6, kind: input, shape index: {}]   ;;  %s1692_s7 = inlined_call_operand.hbm [shape: bf16[128,128], index: 7, kind: input, shape index: {}]   ;;  %s1693_s8 = inlined_call_operand.vmem [shape: f32[1,128], index: 8, kind: input, shape index: {}]   ;;  %s1694_s9 = inlined_call_operand.hbm [shape: f32[8,128], index: 9, kind: output, shape index: {}]  }
   0x1   :  { %15 = vsyncpa [#allocation6], 0 }
   0x2   :  { %16 = vsyncpa [#allocation9], 0 }
   0x3   :  { %17 = vsyncpa [#allocation4], 0  ;;  %s1496_s30 = smov [#allocation5]   ;;  %s1356_s13 = scalar_lea.hbm %s1686_s1, 6272 }
   0x4   :  { %s33_s10 = sshll.u32 %s1496_s30, 4  ;;  %p1357_p0 = scmp.ne.s32.totalorder %s1686_s1, %s1356_s13  ;;  %s34_s10 = int_to_ptr.vmem [resolvable:$true] %s33_s10 }
   0x5   :  { %p1360_p1 = scmp.lt.u32.totalorder %s1356_s13, %s1686_s1 }
   0x7   :  { %p1362_p2 = pnand %p1360_p1, %p1357_p0 }
   0x9   :  { %1365 = shalt.err (!%p1362_p2)
}
   0xa   :  { %s1366_s18 = scalar_lea.vmem %s34_s10, 6272  ;;  %p1371_p4 = scmp.lt.s32.totalorder %s34_s10, %s34_s10 }
   0xb   :  { %p1367_p3 = scmp.ne.s32.totalorder %s34_s10, %s1366_s18  ;;  %p1372_p5 = scmp.lt.s32.totalorder %s1366_s18, %s1366_s18 }
   0xd   :  { %p1373_p6 = por %p1372_p5, %p1371_p4 }
   0xf   :  { %p1374_p7 = pnand %p1373_p6, %p1367_p3 }
  0x11   :  { %1377 = shalt.err (!%p1374_p7)
}
  0x12   :  { %s1497_s19 = smov 64   ;;  %s1498_s20 = smov 4  }
  0x13   :  { %39 = dma.hbm_to_vmem [thread:$0]  %s1686_s1, 6272, %s34_s10, [#allocation6], %s1497_s19, %s1497_s19, %s1498_s20  }
  0x14   :  { %s1499_s23 = smov [#allocation8]   ;;  %s1500_s25 = smov [#allocation2]  }
  0x15   :  { %s61_s24 = sshll.u32 %s1499_s23, 4  ;;  %s24_s26 = sshll.u32 %s1500_s25, 4  ;;  %s62_s24 = int_to_ptr.vmem [resolvable:$true] %s61_s24  ;;  %s25_s26 = int_to_ptr.vmem [resolvable:$true] %s24_s26 }
  0x16   :  { %s1378_s29 = scalar_lea.hbm %s1690_s5, 1024 }
  0x17   :  { %p1379_p8 = scmp.ne.s32.totalorder %s1690_s5, %s1378_s29  ;;  %p1382_p9 = scmp.lt.u32.totalorder %s1378_s29, %s1690_s5 }
  0x19   :  { %p1384_p10 = pnand %p1382_p9, %p1379_p8 }
  0x1b   :  { %1387 = shalt.err (!%p1384_p10)
}
  0x1c   :  { %s1388_s1 = scalar_lea.vmem %s62_s24, 1024  ;;  %p1393_p12 = scmp.lt.s32.totalorder %s62_s24, %s62_s24 }
  0x1d   :  { %p1389_p11 = scmp.ne.s32.totalorder %s62_s24, %s1388_s1  ;;  %p1394_p13 = scmp.lt.s32.totalorder %s1388_s1, %s1388_s1 }
  0x1f   :  { %p1395_p0 = por %p1394_p13, %p1393_p12 }
  0x21   :  { %p1396_p1 = pnand %p1395_p0, %p1389_p11 }
  0x23   :  { %1399 = shalt.err (!%p1396_p1)
}
  0x24   :  { %67 = dma.hbm_to_vmem [thread:$0]  %s1690_s5, 1024, %s62_s24, [#allocation9], %s1497_s19, %s1497_s19, %s1498_s20  }
  0x25   :  { %s1400_s17 = scalar_lea.hbm %s1685_s0, 896 }
  0x26   :  { %p1401_p2 = scmp.ne.s32.totalorder %s1685_s0, %s1400_s17  ;;  %p1404_p3 = scmp.lt.u32.totalorder %s1400_s17, %s1685_s0 }
  0x28   :  { %p1406_p4 = pnand %p1404_p3, %p1401_p2 }
  0x2a   :  { %1409 = shalt.err (!%p1406_p4)
}
  0x2b   :  { %s1410_s25 = scalar_lea.vmem %s25_s26, 896  ;;  %p1415_p6 = scmp.lt.s32.totalorder %s25_s26, %s25_s26 }
  0x2c   :  { %p1411_p5 = scmp.ne.s32.totalorder %s25_s26, %s1410_s25  ;;  %p1416_p7 = scmp.lt.s32.totalorder %s1410_s25, %s1410_s25 }
  0x2e   :  { %p1417_p8 = por %p1416_p7, %p1415_p6 }
  0x30   :  { %p1418_p9 = pnand %p1417_p8, %p1411_p5 }
  0x32   :  { %1421 = shalt.err (!%p1418_p9)
}
  0x33   :  { %27 = dma.hbm_to_vmem [thread:$0]  %s1685_s0, 896, %s25_s26, [#allocation3]  }
  0x34   :  { %s1501_s27 = smov [#allocation7]   ;;  %s1502_s29 = smov [#allocation10]  }
  0x35   :  { %s47_s28 = sshll.u32 %s1501_s27, 4  ;;  %s75_s30 = sshll.u32 %s1502_s29, 4  ;;  %s48_s28 = int_to_ptr.vmem [resolvable:$true] %s47_s28  ;;  %s76_s30 = int_to_ptr.vmem [resolvable:$true] %s75_s30 }
  0x36   :  { %s1422_s13 = scalar_lea.hbm %s1688_s3, 1024 }
  0x37   :  { %p1423_p10 = scmp.ne.s32.totalorder %s1688_s3, %s1422_s13  ;;  %p1426_p11 = scmp.lt.u32.totalorder %s1422_s13, %s1688_s3 }
  0x39   :  { %p1428_p12 = pnand %p1426_p11, %p1423_p10 }
  0x3b   :  { %1431 = shalt.err (!%p1428_p12)
}
  0x3c   :  { %s1432_s0 = scalar_lea.vmem %s48_s28, 1024  ;;  %p1437_p0 = scmp.lt.s32.totalorder %s48_s28, %s48_s28 }
  0x3d   :  { %p1433_p13 = scmp.ne.s32.totalorder %s48_s28, %s1432_s0  ;;  %p1438_p1 = scmp.lt.s32.totalorder %s1432_s0, %s1432_s0 }
  0x3f   :  { %p1439_p2 = por %p1438_p1, %p1437_p0 }
  0x41   :  { %p1440_p3 = pnand %p1439_p2, %p1433_p13 }
  0x43   :  { %1443 = shalt.err (!%p1440_p3)
}
  0x44   :  { %53 = dma.hbm_to_vmem [thread:$0]  %s1688_s3, 1024, %s48_s28, [#allocation6], %s1497_s19, %s1497_s19, %s1498_s20  }
  0x45   :  { %s1444_s21 = scalar_lea.hbm %s1692_s7, 1024 }
  0x46   :  { %p1445_p4 = scmp.ne.s32.totalorder %s1692_s7, %s1444_s21  ;;  %p1448_p5 = scmp.lt.u32.totalorder %s1444_s21, %s1692_s7 }
  0x48   :  { %p1450_p6 = pnand %p1448_p5, %p1445_p4 }
  0x4a   :  { %1453 = shalt.err (!%p1450_p6)
}
  0x4b   :  { %s1454_s24 = scalar_lea.vmem %s76_s30, 1024  ;;  %p1459_p8 = scmp.lt.s32.totalorder %s76_s30, %s76_s30 }
  0x4c   :  { %p1455_p7 = scmp.ne.s32.totalorder %s76_s30, %s1454_s24  ;;  %p1460_p9 = scmp.lt.s32.totalorder %s1454_s24, %s1454_s24 }
  0x4e   :  { %p1461_p10 = por %p1460_p9, %p1459_p8 }
  0x50   :  { %p1462_p11 = pnand %p1461_p10, %p1455_p7 }
  0x52   :  { %1465 = shalt.err (!%p1462_p11)
}
  0x53   :  { %81 = dma.hbm_to_vmem [thread:$0]  %s1692_s7, 1024, %s76_s30, [#allocation9], %s1497_s19, %s1497_s19, %s1498_s20  }
  0x54   :  { %1488 = dma.done.wait [#allocation3], 896  }
  0x55   :  { %1489 = vsyncadd [#allocation3], 4294966400 }
  0x56   :  { %1490 = dma.done.wait [#allocation6], 7296  }
  0x57   :  { %1491 = vsyncadd [#allocation6], 4294960000 }
  0x58   :  { %1492 = dma.done.wait [#allocation9], 2048  }
  0x59   :  { %1493 = vsyncadd [#allocation9], 4294965248  ;;  %v1283_v0 = vld [vmem:[#allocation5 + $0x40] sm:$0xff]   ;;  %v1287_v4 = vld [vmem:[#allocation5 + $0x48] sm:$0xff]   ;;  %v1503_v44 = vmov 0.0   ;;  %vm1504_vm0 = vmmov 0  }
  0x5a   :  { %v1284_v1 = vld [vmem:[#allocation5] sm:$0xff]   ;;  %1112 = vmatprep.subr.bf16.mxu0 %v1283_v0  ;;  %v1288_v5 = vld [vmem:[#allocation5 + $0x8] sm:$0xff]   ;;  %v1291_v8 = vld [vmem:[#allocation5 + $0x50] sm:$0xff]   ;;  %vm513_vm1 = vcmask 130048   ;;  %s1505_s11 = smov [#allocation11]  }
  0x5b   :  { %v1285_v2 = vld [vmem:[#allocation5 + $0xc0] sm:$0xff]   ;;  %1113 = vmatpush3.bf16.msra.mxu0 %v1284_v1  ;;  %v1289_v6 = vld [vmem:[#allocation5 + $0xc8] sm:$0xff]   ;;  %v1292_v9 = vld [vmem:[#allocation5 + $0x10] sm:$0xff]   ;;  %s1023_s12 = sshll.u32 %s1505_s11, 4  ;;  %s1024_s12 = int_to_ptr.vmem [resolvable:$true] %s1023_s12 }
  0x5c   :  { %v1286_v3 = vld [vmem:[#allocation5 + $0x80] sm:$0xff]   ;;  %1134 = vmatprep.subr.bf16.mxu1 %v1285_v2  ;;  %1114 = vmatprep.subr.bf16.mxu0 %v1287_v4  ;;  %v1290_v7 = vld [vmem:[#allocation5 + $0x88] sm:$0xff]   ;;  %v1293_v10 = vld [vmem:[#allocation5 + $0xd0] sm:$0xff]   ;;  %p1471_p13 = scmp.lt.s32.totalorder %s1024_s12, %s1024_s12 }
  0x5d   :  { %1135 = vmatpush3.bf16.msra.mxu1 %v1286_v3  ;;  %v1294_v11 = vld [vmem:[#allocation5 + $0x90] sm:$0xff]   ;;  %v1295_v12 = vld [vmem:[#allocation5 + $0x58] sm:$0xff]   ;;  %v1299_v16 = vld [vmem:[#allocation5 + $0x60] sm:$0xff]  }
  0x5e   :  { %1136 = vmatprep.subr.bf16.mxu1 %v1289_v6  ;;  %v1296_v13 = vld [vmem:[#allocation5 + $0x18] sm:$0xff]   ;;  %v1300_v17 = vld [vmem:[#allocation5 + $0x20] sm:$0xff]   ;;  %v1303_v20 = vld [vmem:[#allocation5 + $0x68] sm:$0xff]  }
  0x5f   :  { %1115 = vmatpush3.bf16.msra.mxu0 %v1288_v5  ;;  %v1297_v14 = vld [vmem:[#allocation5 + $0xd8] sm:$0xff]   ;;  %v1301_v18 = vld [vmem:[#allocation5 + $0xe0] sm:$0xff]   ;;  %v1304_v21 = vld [vmem:[#allocation5 + $0x28] sm:$0xff]  }
  0x60   :  { %1116 = vmatprep.subr.bf16.mxu0 %v1291_v8  ;;  %v1298_v15 = vld [vmem:[#allocation5 + $0x98] sm:$0xff]   ;;  %v1302_v19 = vld [vmem:[#allocation5 + $0xa0] sm:$0xff]   ;;  %v1305_v22 = vld [vmem:[#allocation5 + $0xe8] sm:$0xff]  }
  0x61   :  { %1137 = vmatpush3.bf16.msra.mxu1 %v1290_v7  ;;  %v1306_v23 = vld [vmem:[#allocation5 + $0xa8] sm:$0xff]   ;;  %v1307_v24 = vld [vmem:[#allocation5 + $0x70] sm:$0xff]   ;;  %v1311_v28 = vld [vmem:[#allocation5 + $0x78] sm:$0xff]  }
  0x62   :  { %1138 = vmatprep.subr.bf16.mxu1 %v1293_v10  ;;  %v1308_v25 = vld [vmem:[#allocation5 + $0x30] sm:$0xff]   ;;  %v1312_v29 = vld [vmem:[#allocation5 + $0x38] sm:$0xff]   ;;  %v100_v34 = vld [vmem:[#allocation2] sm:$0xff] }
  0x63   :  { %1117 = vmatpush3.bf16.msra.mxu0 %v1292_v9  ;;  %v1309_v26 = vld [vmem:[#allocation5 + $0xf0] sm:$0xff]   ;;  %v1313_v30 = vld [vmem:[#allocation5 + $0xf8] sm:$0xff]   ;;  %v107_v35 = vpack.c.bf16 %v100_v34, %v100_v34  ;;  %v1315_v36 = vld [vmem:[#allocation5 + $0x140] sm:$0xff]  }
  0x64   :  { %1118 = vmatprep.subr.bf16.mxu0 %v1295_v12  ;;  %v1310_v27 = vld [vmem:[#allocation5 + $0xb0] sm:$0xff]   ;;  %v1314_v33 = vld [vmem:[#allocation5 + $0xb8] sm:$0xff]   ;;  %v103_v37 = vld [vmem:[#allocation2 + $0x18] sm:$0xff] }
  0x65   :  { %1139 = vmatpush3.bf16.msra.mxu1 %v1294_v11  ;;  %v101_v31 = vld [vmem:[#allocation2 + $0x8] sm:$0xff]  ;;  %v110_v38 = vpack.c.bf16 %v103_v37, %v103_v37  ;;  %v1316_v39 = vld [vmem:[#allocation5 + $0x100] sm:$0xff]   ;;  %v102_v40 = vld [vmem:[#allocation2 + $0x10] sm:$0xff] }
  0x66   :  { %1140 = vmatprep.subr.bf16.mxu1 %v1297_v14  ;;  %v108_v32 = vpack.c.bf16 %v101_v31, %v101_v31  ;;  %v109_v41 = vpack.c.bf16 %v102_v40, %v102_v40  ;;  %v1317_v42 = vld [vmem:[#allocation5 + $0x148] sm:$0xff]   ;;  %v1319_v45 = vld [vmem:[#allocation5 + $0x150] sm:$0xff]   ;;  %v1321_v47 = vld [vmem:[#allocation5 + $0x158] sm:$0xff]  }
  0x67   :  { %1119 = vmatpush3.bf16.msra.mxu0 %v1296_v13  ;;  %589 = vmatprep.mubr.bf16.mxu1 %v110_v38  ;;  %v1318_v43 = vld [vmem:[#allocation5 + $0x108] sm:$0xff]   ;;  %v1320_v46 = vld [vmem:[#allocation5 + $0x110] sm:$0xff]   ;;  %v1322_v48 = vld [vmem:[#allocation5 + $0x118] sm:$0xff]  }
  0x68   :  { %1120 = vmatprep.subr.bf16.mxu0 %v1299_v16  ;;  %549 = vmatprep.mubr.bf16.mxu0 %v108_v32  ;;  %v1323_v49 = vld [vmem:[#allocation5 + $0x160] sm:$0xff]   ;;  %v1325_v51 = vld [vmem:[#allocation5 + $0x168] sm:$0xff]   ;;  %v105_v54 = vld [vmem:[#allocation2 + $0x28] sm:$0xff] }
  0x69   :  { %1141 = vmatpush3.bf16.msra.mxu1 %v1298_v15  ;;  %v1324_v50 = vld [vmem:[#allocation5 + $0x120] sm:$0xff]   ;;  %v1326_v52 = vld [vmem:[#allocation5 + $0x128] sm:$0xff]   ;;  %v1327_v55 = vld [vmem:[#allocation5 + $0x170] sm:$0xff]   ;;  %v112_v56 = vpack.c.bf16 %v105_v54, %v105_v54 }
  0x6a   :  { %1142 = vmatprep.subr.bf16.mxu1 %v1301_v18  ;;  %v1331_v53 = vld [vmem:[#allocation5 + $0x180] sm:$0xff]   ;;  %v106_v57 = vld [vmem:[#allocation2 + $0x30] sm:$0xff]  ;;  %v1328_v59 = vld [vmem:[#allocation5 + $0x130] sm:$0xff]  }
  0x6b   :  { %1121 = vmatpush3.bf16.msra.mxu0 %v1300_v17  ;;  %v113_v58 = vpack.c.bf16 %v106_v57, %v106_v57  ;;  %v1329_v60 = vld [vmem:[#allocation5 + $0x178] sm:$0xff]   ;;  %v104_v62 = vld [vmem:[#allocation2 + $0x20] sm:$0xff]  ;;  %v1333_v1 = vld [vmem:[#allocation7 + $0x8] sm:$0xff]  }
  0x6c   :  { %1122 = vmatprep.subr.bf16.mxu0 %v1303_v20  ;;  %v1330_v61 = vld [vmem:[#allocation5 + $0x138] sm:$0xff]   ;;  %v111_v63 = vpack.c.bf16 %v104_v62, %v104_v62  ;;  %v1332_v0 = vld [vmem:[#allocation7] sm:$0xff]   ;;  %v1335_v3 = vld [vmem:[#allocation7 + $0x18] sm:$0xff]  }
  0x6d   :  { %1143 = vmatpush3.bf16.msra.mxu1 %v1302_v19  ;;  %v1334_v2 = vld [vmem:[#allocation7 + $0x10] sm:$0xff]   ;;  %v1336_v4 = vld [vmem:[#allocation7 + $0x20] sm:$0xff]   ;;  %v1337_v5 = vld [vmem:[#allocation7 + $0x28] sm:$0xff]  }
  0x6e   :  { %1144 = vmatprep.subr.bf16.mxu1 %v1305_v22  ;;  %v1338_v6 = vld [vmem:[#allocation7 + $0x30] sm:$0xff]   ;;  %v1339_v7 = vld [vmem:[#allocation7 + $0x38] sm:$0xff]   ;;  %v1340_v8 = vld [vmem:[#allocation8] sm:$0xff]  }
  0x6f   :  { %1123 = vmatpush3.bf16.msra.mxu0 %v1304_v21  ;;  %v1341_v9 = vld [vmem:[#allocation8 + $0x8] sm:$0xff]   ;;  %v1342_v10 = vld [vmem:[#allocation8 + $0x10] sm:$0xff]   ;;  %v1343_v11 = vld [vmem:[#allocation8 + $0x18] sm:$0xff]  }
  0x70   :  { %1124 = vmatprep.subr.bf16.mxu0 %v1307_v24  ;;  %v1344_v12 = vld [vmem:[#allocation8 + $0x20] sm:$0xff]   ;;  %v1345_v13 = vld [vmem:[#allocation8 + $0x28] sm:$0xff]   ;;  %v1346_v40 = vld [vmem:[#allocation8 + $0x30] sm:$0xff]  }
  0x71   :  { %1145 = vmatpush3.bf16.msra.mxu1 %v1306_v23  ;;  %v1034_v15 = vld [vmem:[%s1687_s2] ss:$0 sm:$0xff]  ;;  %v1354_v57 = vld [vmem:[#allocation10 + $0x30] sm:$0xff]  }
  0x72   :  { %1146 = vmatprep.subr.bf16.mxu1 %v1309_v26 }
  0x73   :  { %1125 = vmatpush3.bf16.msra.mxu0 %v1308_v25 }
  0x74   :  { %1126 = vmatprep.subr.bf16.mxu0 %v1311_v28 }
  0x75   :  { %1147 = vmatpush3.bf16.msra.mxu1 %v1310_v27 }
  0x76   :  { %1148 = vmatprep.subr.bf16.mxu1 %v1313_v30 }
  0x77   :  { %1127 = vmatpush3.bf16.msra.mxu0 %v1312_v29 }
  0x78   :  { %1156 = vmatprep.subr.bf16.mxu0 %v1315_v36 }
  0x79   :  { %1149 = vmatpush3.bf16.msra.mxu1 %v1314_v33 }
  0x7a   :  { %550 = vmatmul.mubr.bf16.vlgmr.msra.gmra.mrb[0].mxu0 %v107_v35  ;;  %1207 = vmatprep.subr.bf16.mxu1 %v1503_v44 }
  0x7b   :  { %1157 = vmatpush3.bf16.msra.mxu0 %v1316_v39  ;;  %629 = vmatprep.mubr.bf16.mxu0 %v112_v56 }
  0x7c   :  { %590 = vmatmul.mubr.bf16.vlgmr.msra.gmra.mrb[0].mxu1 %v109_v41  ;;  %1158 = vmatprep.subr.bf16.mxu0 %v1317_v42  ;;  %v1347_v41 = vld [vmem:[#allocation8 + $0x38] sm:$0xff]   ;;  %v1348_v42 = vld [vmem:[#allocation10] sm:$0xff]  }
  0x7d   :  { %1209 = vmatprep.mubr.msk.bf16.mxu1 %vm1504_vm0, %v1503_v44  ;;  %1208 = vmatpush3.bf16.msra.mxu1 %v1331_v53 }
  0x7e   :  { %1213 = vmatprep.subr.bf16.mxu1 %v1503_v44 }
  0x7f   :  { %1159 = vmatpush3.bf16.msra.mxu0 %v1318_v43  ;;  %v1349_v43 = vld [vmem:[#allocation10 + $0x8] sm:$0xff]  }
  0x80   :  { %1160 = vmatprep.subr.bf16.mxu0 %v1319_v45  ;;  %v1350_v45 = vld [vmem:[#allocation10 + $0x10] sm:$0xff]  }
  0x83   :  { %1161 = vmatpush3.bf16.msra.mxu0 %v1320_v46  ;;  %v1351_v46 = vld [vmem:[#allocation10 + $0x18] sm:$0xff]  }
  0x84   :  { %1162 = vmatprep.subr.bf16.mxu0 %v1321_v47  ;;  %1210 = vmatmul.mubr.msk.bf16.vlgmr.msra.gmra.mrb[4].mxu1 %vm513_vm1, %v113_v58  ;;  %v1352_v47 = vld [vmem:[#allocation10 + $0x20] sm:$0xff]   ;;  %v1355_v58 = vld [vmem:[#allocation10 + $0x38] sm:$0xff]  }
  0x85   :  { %1229 = vmatprep.mubr.msk.bf16.mxu1 %vm1504_vm0, %v1503_v44  ;;  %1214 = vmatpush3.bf16.msra.mxu1 %v1332_v0 }
  0x86   :  { %1215 = vmatprep.subr.bf16.mxu1 %v1503_v44 }
  0x87   :  { %1163 = vmatpush3.bf16.msra.mxu0 %v1322_v48  ;;  %v1353_v48 = vld [vmem:[#allocation10 + $0x28] sm:$0xff]  }
  0x88   :  { %1164 = vmatprep.subr.bf16.mxu0 %v1323_v49  ;;  %v1085_v49 = vld [vmem:[%s1689_s4] ss:$0 sm:$0xff] }
  0x89   :  { %1216 = vmatpush3.bf16.msra.mxu1 %v1333_v1 }
  0x8a   :  { %1217 = vmatprep.subr.bf16.mxu1 %v1503_v44 }
  0x8b   :  { %1165 = vmatpush3.bf16.msra.mxu0 %v1324_v50 }
  0x8c   :  { %1166 = vmatprep.subr.bf16.mxu0 %v1325_v51 }
  0x8d   :  { %1218 = vmatpush3.bf16.msra.mxu1 %v1334_v2 }
  0x8e   :  { %1219 = vmatprep.subr.bf16.mxu1 %v1503_v44 }
  0x8f   :  { %1167 = vmatpush3.bf16.msra.mxu0 %v1326_v52 }
  0x90   :  { %1168 = vmatprep.subr.bf16.mxu0 %v1327_v55 }
  0x91   :  { %1220 = vmatpush3.bf16.msra.mxu1 %v1335_v3  ;;  %v1103_v3 = vld [vmem:[%s1693_s8] ss:$0 sm:$0xff] }
  0x92   :  { %1221 = vmatprep.subr.bf16.mxu1 %v1503_v44 }
  0x93   :  { %1169 = vmatpush3.bf16.msra.mxu0 %v1328_v59  ;;  %v1094_v59 = vld [vmem:[%s1691_s6] ss:$0 sm:$0xff]  ;;  %s1466_s6 = scalar_lea.vmem %s1024_s12, 128 }
  0x94   :  { %1170 = vmatprep.subr.bf16.mxu0 %v1329_v60  ;;  %p1467_p12 = scmp.ne.s32.totalorder %s1024_s12, %s1466_s6  ;;  %p1472_p0 = scmp.lt.s32.totalorder %s1466_s6, %s1466_s6 }
  0x95   :  { %1222 = vmatpush3.bf16.msra.mxu1 %v1336_v4 }
  0x96   :  { %1223 = vmatprep.subr.bf16.mxu1 %v1503_v44  ;;  %p1473_p1 = por %p1472_p0, %p1471_p13 }
  0x97   :  { %1171 = vmatpush3.bf16.msra.mxu0 %v1330_v61 }
  0x98   :  { %1233 = vmatprep.subr.bf16.mxu0 %v1503_v44  ;;  %p1474_p2 = pnand %p1473_p1, %p1467_p12 }
  0x99   :  { %1224 = vmatpush3.bf16.msra.mxu1 %v1337_v5 }
  0x9a   :  { %630 = vmatmul.mubr.bf16.vlgmr.msra.gmra.mrb[4].mxu0 %v111_v63  ;;  %1225 = vmatprep.subr.bf16.mxu1 %v1503_v44 }
  0x9b   :  { %1249 = vmatprep.mubr.msk.bf16.mxu0 %vm1504_vm0, %v1503_v44  ;;  %1234 = vmatpush3.bf16.msra.mxu0 %v1340_v8 }
  0x9c   :  { %1235 = vmatprep.subr.bf16.mxu0 %v1503_v44 }
  0x9d   :  { %1226 = vmatpush3.bf16.msra.mxu1 %v1338_v6 }
  0x9e   :  { %1227 = vmatprep.subr.bf16.mxu1 %v1503_v44 }
  0x9f   :  { %1236 = vmatpush3.bf16.msra.mxu0 %v1341_v9 }
  0xa0   :  { %1237 = vmatprep.subr.bf16.mxu0 %v1503_v44 }
  0xa1   :  { %1228 = vmatpush3.bf16.msra.mxu1 %v1339_v7 }
  0xa2   :  { %1253 = vmatprep.subr.bf16.mxu1 %v1503_v44 }
  0xa3   :  { %1238 = vmatpush3.bf16.msra.mxu0 %v1342_v10 }
  0xa4   :  { %1239 = vmatprep.subr.bf16.mxu0 %v1503_v44 }
  0xa7   :  { %1240 = vmatpush3.bf16.msra.mxu0 %v1343_v11 }
  0xa8   :  { %1241 = vmatprep.subr.bf16.mxu0 %v1503_v44 }
  0xab   :  { %1242 = vmatpush3.bf16.msra.mxu0 %v1344_v12 }
  0xac   :  { %1243 = vmatprep.subr.bf16.mxu0 %v1503_v44 }
  0xaf   :  { %1244 = vmatpush3.bf16.msra.mxu0 %v1345_v13 }
  0xb0   :  { %1245 = vmatprep.subr.bf16.mxu0 %v1503_v44 }
  0xb3   :  { %1246 = vmatpush3.bf16.msra.mxu0 %v1346_v40 }
  0xb4   :  { %1247 = vmatprep.subr.bf16.mxu0 %v1503_v44 }
  0xb7   :  { %1248 = vmatpush3.bf16.msra.mxu0 %v1347_v41 }
 0x14d   :  { %v1128_v14 = vpop.f32.mrb[0].mxu0 }
 0x14e   :  { %v1129_v16 = vpop.f32.mrb[1].mxu0 }
 0x14f   :  { %v1130_v17 = vadd.f32 %v1129_v16, %v1128_v14  ;;  %v1131_v18 = vpop.f32.mrb[2].mxu0  ;;  %v1150_v19 = vpop.f32.mrb[0].mxu1 }
 0x150   :  { %v1132_v20 = vpop.f32.mrb[3].mxu0  ;;  %v1151_v22 = vpop.f32.mrb[1].mxu1 }
 0x151   :  { %v552_v21 = vadd.f32 %v1130_v17, %v1034_v15  ;;  %v1152_v23 = vadd.f32 %v1151_v22, %v1150_v19  ;;  %v1153_v24 = vpop.f32.mrb[2].mxu1 }
 0x152   :  { %v1154_v25 = vpop.f32.mrb[3].mxu1 }
 0x153   :  { %v592_v26 = vadd.f32 %v1152_v23, %v552_v21 }
 0x157   :  { %v671_v27 = vpop.f32.mrb[4].mxu1 }
 0x158   :  { %v1211_v28 = vpop.f32.mrb[5].mxu1 }
 0x159   :  { %v674_v29 = vpop.f32.mrb[6].mxu1 }
 0x15a   :  { %v1212_v30 = vpop.f32.mrb[7].mxu1 }
 0x16d   :  { %v1172_v31 = vpop.f32.mrb[4].mxu0 }
 0x16e   :  { %v1173_v32 = vpop.f32.mrb[5].mxu0 }
 0x16f   :  { %v1174_v33 = vadd.f32 %v1173_v32, %v1172_v31  ;;  %v1175_v34 = vpop.f32.mrb[6].mxu0 }
 0x170   :  { %v1176_v35 = vpop.f32.mrb[7].mxu0 }
 0x171   :  { %v632_v36 = vadd.f32 %v1174_v33, %v592_v26 }
 0x173   :  { %v672_v37 = vadd.f32 %v671_v27, %v632_v36 }
 0x175   :  { %v677_v38 = vmax.f32 %v672_v37, 0.0 }
 0x177   :  { %v678_v39 = vpack.c.bf16 %v677_v38, %v677_v38 }
 0x179   :  { %1230 = vmatmul.mubr.bf16.vlgmr.msra.gmra.mrb[8].mxu1 %v678_v39 }
 0x17a   :  { %1269 = vmatprep.mubr.msk.bf16.mxu1 %vm1504_vm0, %v1503_v44  ;;  %1254 = vmatpush3.bf16.msra.mxu1 %v1348_v42 }
 0x17b   :  { %1255 = vmatprep.subr.bf16.mxu1 %v1503_v44 }
 0x17e   :  { %1256 = vmatpush3.bf16.msra.mxu1 %v1349_v43 }
 0x17f   :  { %1257 = vmatprep.subr.bf16.mxu1 %v1503_v44 }
 0x182   :  { %1258 = vmatpush3.bf16.msra.mxu1 %v1350_v45 }
 0x183   :  { %1259 = vmatprep.subr.bf16.mxu1 %v1503_v44 }
 0x186   :  { %1260 = vmatpush3.bf16.msra.mxu1 %v1351_v46 }
 0x187   :  { %1261 = vmatprep.subr.bf16.mxu1 %v1503_v44 }
 0x18a   :  { %1262 = vmatpush3.bf16.msra.mxu1 %v1352_v47 }
 0x18b   :  { %1263 = vmatprep.subr.bf16.mxu1 %v1503_v44 }
 0x18e   :  { %1264 = vmatpush3.bf16.msra.mxu1 %v1353_v48 }
 0x18f   :  { %1265 = vmatprep.subr.bf16.mxu1 %v1503_v44 }
 0x192   :  { %1266 = vmatpush3.bf16.msra.mxu1 %v1354_v57 }
 0x193   :  { %1267 = vmatprep.subr.bf16.mxu1 %v1503_v44 }
 0x196   :  { %1268 = vmatpush3.bf16.msra.mxu1 %v1355_v58 }
 0x24c   :  { %v784_v50 = vpop.f32.mrb[8].mxu1 }
 0x24d   :  { %v785_v51 = vadd.f32 %v1085_v49, %v784_v50  ;;  %v1231_v52 = vpop.f32.mrb[9].mxu1 }
 0x24e   :  { %v787_v53 = vpop.f32.mrb[10].mxu1 }
 0x24f   :  { %v790_v54 = vmax.f32 %v785_v51, 0.0  ;;  %v1232_v55 = vpop.f32.mrb[11].mxu1 }
 0x251   :  { %v791_v56 = vpack.c.bf16 %v790_v54, %v790_v54 }
 0x253   :  { %1250 = vmatmul.mubr.bf16.vlgmr.msra.gmra.mrb[8].mxu0 %v791_v56 }
 0x326   :  { %v897_v60 = vpop.f32.mrb[8].mxu0 }
 0x327   :  { %v898_v61 = vadd.f32 %v1094_v59, %v897_v60  ;;  %v1251_v62 = vpop.f32.mrb[9].mxu0 }
 0x328   :  { %v900_v63 = vpop.f32.mrb[10].mxu0 }
 0x329   :  { %v903_v0 = vmax.f32 %v898_v61, 0.0  ;;  %v1252_v1 = vpop.f32.mrb[11].mxu0 }
 0x32b   :  { %v904_v2 = vpack.c.bf16 %v903_v0, %v903_v0 }
 0x32d   :  { %1270 = vmatmul.mubr.bf16.vlgmr.msra.gmra.mrb[12].mxu1 %v904_v2 }
 0x400   :  { %v1010_v44 = vpop.f32.mrb[12].mxu1 }
 0x401   :  { %v1011_v4 = vadd.f32 %v1103_v3, %v1010_v44  ;;  %v1271_v5 = vpop.f32.mrb[13].mxu1 }
 0x402   :  { %v1013_v6 = vpop.f32.mrb[14].mxu1 }
 0x403   :  { %1016 = vst [vmem:[#allocation11] sm:$0xff] %v1011_v4  ;;  %v1272_v7 = vpop.f32.mrb[15].mxu1 }
 0x404   :  { %1477 = shalt.err (!%p1474_p2)
}
 0x405   :  { %s1478_s8 = scalar_lea.hbm %s1694_s9, 128 }
 0x406   :  { %p1479_p3 = scmp.ne.s32.totalorder %s1694_s9, %s1478_s8  ;;  %p1482_p4 = scmp.lt.u32.totalorder %s1478_s8, %s1694_s9 }
 0x408   :  { %p1484_p5 = pnand %p1482_p4, %p1479_p3 }
 0x40a   :  { %1487 = shalt.err (!%p1484_p5)
}
 0x40b   :  { %1026 = dma.vmem_to_hbm [thread:$0]  %s1024_s12, 128, %s1694_s9, [#allocation4]  }
 0x40c   :  { %1494 = dma.done.wait [#allocation4], 128  }
 0x40d   :  { %1495 = vsyncadd [#allocation4], 4294967168 }
 0x40e   :  { %1030 = vsyncpa [#allocation3], 1 }
 0x40f   :  { %1031 = vsyncpa [#allocation6], 1 }
 0x410   :  { %1032 = vsyncpa [#allocation9], 1 }
 0x411   :  { %1033 = vsyncpa [#allocation4], 1 }

</bundles_post_ra>
